<compile_context>
chip_gen: v7x
topology: tpu7x:2x2x1
jax: 0.10.0
libtpu: 0.0.40
codegen_flags: <defaults>
</compile_context>

<pallas_src>
import functools

import jax
import jax.numpy as jnp
from jax.experimental import pallas as pl
from jax.experimental.pallas import tpu as pltpu


def _round_up(x, m):
    return (x + m - 1) // m * m


def _pad_gates(w, h, hp):
    """Pad each of the 3 GRU gate blocks (r|z|n) along the last axis from h to hp."""
    if hp == h:
        return w
    pad = [(0, 0)] * (w.ndim - 1) + [(0, hp - h)]
    parts = [jnp.pad(w[..., i * h:(i + 1) * h], pad) for i in range(3)]
    return jnp.concatenate(parts, axis=-1)


def _gru_seq_kernel(maxlen_ref,                                   # SMEM scalar prefetch (1,)
                    len_ref, gi_ref, mask_h_ref, b_hn_ref,        # VMEM inputs
                    w_hh_hbm,                                     # pl.ANY (HBM) input
                    out_ref,                                      # VMEM output (B, Hp)
                    h_ref, w_hh_vmem, dma_sem,                    # scratch
                    *, hidden, t_block, batch, param_dtype):
    blk = pl.program_id(0)
    t0 = blk * t_block
    H = hidden          # padded hidden (multiple of 128)
    B = batch           # padded batch (multiple of 8)

    @pl.when(blk == 0)
    def _init():
        h_ref[...] = jnp.zeros_like(h_ref)
        out_ref[...] = jnp.zeros_like(out_ref)

    # Single-buffered, VMEM-resident W_hh: one async copy started at blk 0, waited just
    # before its first use inside the first active block (paired exactly with the wait).
    @pl.when((blk == 0) & (maxlen_ref[0] > 0))
    def _start_weight_dma():
        pltpu.make_async_copy(w_hh_hbm, w_hh_vmem, dma_sem).start()

    # Skip T-blocks that lie entirely in trailing padding.
    @pl.when(t0 < maxlen_ref[0])
    def _block():
        @pl.when(blk == 0)
        def _wait_weight_dma():
            pltpu.make_async_copy(w_hh_hbm, w_hh_vmem, dma_sem).wait()

        mask_h = mask_h_ref[...]                                  # (B, Hp) dropout mask on h
        b_hn = b_hn_ref[...]                                      # (1, Hp) n-gate hidden bias
        lens = len_ref[...]                                       # (B, 1) int32
        w_hh = w_hh_vmem[...]                                     # (Hp, 3Hp) resident weights

        def step(t, h):
            h_drop = h * mask_h                                   # SequentialDropout on h
            gh = jnp.dot(h_drop.astype(param_dtype), w_hh,
                         preferred_element_type=jnp.float32)      # (B, 3Hp)
            row0 = pl.multiple_of(t * B, B)                       # sublane-aligned offset
            gi = gi_ref[pl.ds(row0, B), :].astype(jnp.float32)    # (B, 3Hp), bias pre-added
            r = jax.nn.sigmoid(gi[:, :H] + gh[:, :H])
            z = jax.nn.sigmoid(gi[:, H:2 * H] + gh[:, H:2 * H])
            n = jnp.tanh(gi[:, 2 * H:] + r * (gh[:, 2 * H:] + b_hn))
            h_new = (1.0 - z) * n + z * h_drop                    # PyTorch GRUCell update
            # _select_last via freeze: rows whose sequence ended keep their last value.
            return jnp.where((t0 + t) < lens, h_new, h)

        h = jax.lax.fori_loop(0, t_block, step, h_ref[...], unroll=True)
        h_ref[...] = h

        # Write the output exactly once, at the last active T-block (later blocks are
        # suppressed by the t0 < maxlen guard, including the exact-boundary case).
        is_last = (blk == pl.num_programs(0) - 1) | (t0 + t_block >= maxlen_ref[0])

        @pl.when(is_last)
        def _write_out():
            out_ref[...] = h


def drop_uni_skip_forward(tokens, emb_table, w_ih_t, w_hh_t, b_ih, b_hh,
                          mask_x, mask_h, *, t_block=16,
                          param_dtype=jnp.float32, gi_dtype=jnp.float32):
    """tokens: (B, S) int32. Returns (B, H) float32 = GRU state at the last real token.

    Production setting (H=2400): param_dtype=gi_dtype=jnp.bfloat16 so the resident W_hh
    and the streamed gi blocks fit / halve HBM traffic (required on v7x's 64 MiB VMEM).
    """
    batch, seq = tokens.shape
    emb_dim = emb_table.shape[1]
    hidden = w_hh_t.shape[0]

    # Lane/sublane-aligned padded sizes.
    bp = _round_up(batch, 8)
    hp = _round_up(hidden, 128)
    sp = _round_up(seq, t_block)
    nb = sp // t_block

    # _process_lengths (padding zeros assumed trailing, as in the original module).
    lengths = (seq - jnp.sum(tokens == 0, axis=1)).astype(jnp.int32)
    max_len = jnp.max(lengths).reshape(1).astype(jnp.int32)         # -> SMEM scalar prefetch
    len_col = jnp.pad(lengths, (0, bp - batch)).reshape(bp, 1)      # padded rows: length 0

    # Embedding gather in time-major order, dropout mask applied once per call.
    tokens_p = jnp.pad(tokens, ((0, bp - batch), (0, sp - seq)))
    x = jnp.take(emb_table, tokens_p.T, axis=0)                     # (Sp, Bp, E)
    mask_x_p = jnp.pad(mask_x, ((0, bp - batch), (0, 0)))
    x = x * mask_x_p[None]

    # Input projection hoisted out of the kernel: one big (Sp*Bp, E) x (E, 3Hp) matmul.
    # b_hh's r/z parts fold into the bias (they just add to gi_r / gi_z); the n-gate
    # hidden bias must stay separate (multiplied by r inside the cell).
    w_ih_pg = _pad_gates(w_ih_t, hidden, hp)                        # (E, 3Hp) gate-padded
    b_comb = jnp.concatenate([b_ih[:2 * hidden] + b_hh[:2 * hidden], b_ih[2 * hidden:]])
    b_i = _pad_gates(b_comb.reshape(1, 3 * hidden), hidden, hp)     # (1, 3Hp)
    gi = x.reshape(sp * bp, emb_dim) @ w_ih_pg + b_i                # (Sp*Bp, 3Hp) f32
    gi_blocks = gi.reshape(nb, t_block * bp, 3 * hp).astype(gi_dtype)

    # Recurrent weights: pad hidden rows to Hp and each gate column block to Hp.
    w_hh_p = _pad_gates(jnp.pad(w_hh_t, ((0, hp - hidden), (0, 0))), hidden, hp)
    w_hh_p = w_hh_p.astype(param_dtype)                             # streamed / resident dtype
    b_hn = jnp.pad(b_hh[2 * hidden:], (0, hp - hidden)).reshape(1, hp)
    mask_h_p = jnp.pad(mask_h, ((0, bp - batch), (0, hp - hidden)))

    kernel = functools.partial(_gru_seq_kernel, hidden=hp, t_block=t_block,
                               batch=bp, param_dtype=param_dtype)

    # VMEM budget: resident W_hh (single buffer) + double-buffered gi block + small
    # constant-index inputs + h/out + temporaries, clamped to the chip's real capacity.
    w_bytes = hp * 3 * hp * jnp.dtype(param_dtype).itemsize
    gi_bytes = 2 * t_block * bp * 3 * hp * jnp.dtype(gi_dtype).itemsize
    misc_bytes = 2 * (bp * hp * 4 + bp * 4 + hp * 4) + 2 * bp * hp * 4
    needed = w_bytes + gi_bytes + misc_bytes + (4 << 20)
    try:
        cap = int(pltpu.get_tpu_info().vmem_capacity_bytes)
    except Exception:
        cap = 64 << 20                                              # conservative (v7x per-TC)
    vmem_limit = int(min(max(needed, 32 << 20), cap - (8 << 20)))

    out = pl.pallas_call(
        kernel,
        out_shape=jax.ShapeDtypeStruct((bp, hp), jnp.float32),
        grid_spec=pltpu.PrefetchScalarGridSpec(
            num_scalar_prefetch=1,                                  # max_len lives in SMEM
            grid=(nb,),
            in_specs=[
                pl.BlockSpec((bp, 1), lambda b, ml: (0, 0)),                          # lengths
                pl.BlockSpec((pl.Squeezed(), t_block * bp, 3 * hp),
                             lambda b, ml: (b, 0, 0)),                                # gi T-block
                pl.BlockSpec((bp, hp), lambda b, ml: (0, 0)),                         # mask_h
                pl.BlockSpec((1, hp), lambda b, ml: (0, 0)),                          # b_hh n-gate
                pl.BlockSpec(memory_space=pl.ANY),                                    # W_hh^T (HBM)
            ],
            out_specs=pl.BlockSpec((bp, hp), lambda b, ml: (0, 0)),
            scratch_shapes=[
                pltpu.VMEM((bp, hp), jnp.float32),                  # hidden-state carry
                pltpu.VMEM((hp, 3 * hp), param_dtype),              # resident W_hh^T (single buffer)
                pltpu.SemaphoreType.DMA(()),                        # weight-copy semaphore
            ],
        ),
        compiler_params=pltpu.CompilerParams(
            dimension_semantics=("arbitrary",),                     # sequential time recurrence
            vmem_limit_bytes=vmem_limit),
    )(max_len, len_col, gi_blocks, mask_h_p, b_hn, w_hh_p)

    return out[:batch, :hidden]


def reference_forward(tokens, emb_table, w_ih_t, w_hh_t, b_ih, b_hh, mask_x, mask_h):
    """Plain-JAX reference mirroring the PyTorch loop, for a correctness check."""
    batch, seq = tokens.shape
    H = w_hh_t.shape[0]
    lengths = seq - jnp.sum(tokens == 0, axis=1)
    x = jnp.take(emb_table, tokens, axis=0)
    h = jnp.zeros((batch, H), jnp.float32)
    outs = []
    for t in range(seq):
        xt = x[:, t, :] * mask_x
        hd = h * mask_h
        gi = xt @ w_ih_t + b_ih
        gh = hd @ w_hh_t + b_hh
        r = jax.nn.sigmoid(gi[:, :H] + gh[:, :H])
        z = jax.nn.sigmoid(gi[:, H:2 * H] + gh[:, H:2 * H])
        n = jnp.tanh(gi[:, 2 * H:] + r * gh[:, 2 * H:])
        h = (1.0 - z) * n + z * hd
        outs.append(h)
    out = jnp.stack(outs, axis=1)                                   # (B, S, H)
    return out[jnp.arange(batch), lengths - 1]


if __name__ == "__main__":
    # Small shapes consistent with the module (620 / 2400 scaled down; deliberately
    # lane-unaligned to exercise the gate-aware padding path).
    batch, seq = 2, 12
    vocab_size = 20
    emb_dim, hidden = 160, 120
    p_drop = 0.25
    t_block = 4

    key = jax.random.PRNGKey(0)
    k_emb, k_wih, k_whh, k_bih, k_bhh, k_mx, k_mh = jax.random.split(key, 7)

    # Synthetic parameters (nn.Embedding(vocab+1, E, padding_idx=0); nn.GRUCell(E, H)
    # with weight_ih (3H,E), weight_hh (3H,H) -> stored transposed as (E,3H)/(H,3H)).
    emb_table = jax.random.normal(k_emb, (vocab_size + 1, emb_dim), jnp.float32) * 0.1
    emb_table = emb_table.at[0].set(0.0)                            # padding_idx=0
    w_ih_t = jax.random.normal(k_wih, (emb_dim, 3 * hidden), jnp.float32) * 0.05
    w_hh_t = jax.random.normal(k_whh, (hidden, 3 * hidden), jnp.float32) * 0.05
    b_ih = jax.random.normal(k_bih, (3 * hidden,), jnp.float32) * 0.05
    b_hh = jax.random.normal(k_bhh, (3 * hidden,), jnp.float32) * 0.05

    # SequentialDropout masks: sampled once per forward call, reused every timestep.
    mask_x = jax.random.bernoulli(k_mx, 1.0 - p_drop, (batch, emb_dim)).astype(jnp.float32) / (1.0 - p_drop)
    mask_h = jax.random.bernoulli(k_mh, 1.0 - p_drop, (batch, hidden)).astype(jnp.float32) / (1.0 - p_drop)

    # Token ids with 0 = padding. Lengths 5 and 8 -> max_len = 8 = 2*t_block, which
    # exercises the "max_len lands exactly on a T-block boundary" output-write path,
    # plus a trailing all-padding T-block that is skipped entirely.
    tokens = jnp.array([[3, 5, 7, 2, 9, 0, 0, 0, 0, 0, 0, 0],
                        [1, 4, 6, 8, 2, 5, 3, 9, 0, 0, 0, 0]], dtype=jnp.int32)

    ref = reference_forward(tokens, emb_table, w_ih_t, w_hh_t, b_ih, b_hh, mask_x, mask_h)

    # Tight f32 check.
    out = drop_uni_skip_forward(tokens, emb_table, w_ih_t, w_hh_t, b_ih, b_hh,
                                mask_x, mask_h, t_block=t_block,
                                param_dtype=jnp.float32, gi_dtype=jnp.float32)
    out = jax.block_until_ready(out)
    assert out.shape == (batch, hidden)
    assert jnp.allclose(out, ref, atol=1e-4, rtol=1e-4), "f32 mismatch vs JAX reference"

    # Relaxed-tolerance bf16 check (production precision for W_hh / gi stream).
    out_bf16 = drop_uni_skip_forward(tokens, emb_table, w_ih_t, w_hh_t, b_ih, b_hh,
                                     mask_x, mask_h, t_block=t_block,
                                     param_dtype=jnp.bfloat16, gi_dtype=jnp.bfloat16)
    out_bf16 = jax.block_until_ready(out_bf16)
    assert jnp.allclose(out_bf16, ref, atol=5e-2, rtol=5e-2), "bf16 mismatch vs JAX reference"

    print("KERNEL_OK")
</pallas_src>

<mosaic_0001>
module attributes {stable_mosaic.version = 11 : i64} {
  func.func @_gru_seq_kernel(%arg0: i32, %arg1: memref<1xi32, #tpu.memory_space<smem>>, %arg2: memref<8x1xi32, #tpu.memory_space<vmem>>, %arg3: memref<1x32x384xf32, #tpu.memory_space<vmem>>, %arg4: memref<8x128xf32, #tpu.memory_space<vmem>>, %arg5: memref<1x128xf32, #tpu.memory_space<vmem>>, %arg6: memref<128x384xf32, #tpu.memory_space<any>>, %arg7: memref<8x128xf32, #tpu.memory_space<vmem>>, %arg8: memref<8x128xf32, #tpu.memory_space<vmem>>, %arg9: memref<128x384xf32, #tpu.memory_space<vmem>>, %arg10: memref<!tpu.dma_semaphore, #tpu.memory_space<semaphore_mem>>) attributes {dimension_semantics = [#tpu.dimension_semantics<arbitrary>], iteration_bounds = array<i64: 3>, scalar_prefetch = 1 : i64, scratch_operands = 3 : i64, tpu.core_type = #tpu.core_type<tc>, window_params = [{pipeline_mode = #tpu.pipeline_mode<synchronous>, transform_indices = @transform_0, window_bounds = array<i64: 8, 1>}, {transform_indices = @transform_1, window_bounds = array<i64: 1, 32, 384>}, {pipeline_mode = #tpu.pipeline_mode<synchronous>, transform_indices = @transform_2, window_bounds = array<i64: 8, 128>}, {pipeline_mode = #tpu.pipeline_mode<synchronous>, transform_indices = @transform_3, window_bounds = array<i64: 1, 128>}, {}, {pipeline_mode = #tpu.pipeline_mode<synchronous>, transform_indices = @transform_5, window_bounds = array<i64: 8, 128>}]} {
    %c4_i32 = arith.constant 4 : i32
    %0 = arith.muli %arg0, %c4_i32 : i32
    %c0_i32 = arith.constant 0 : i32
    %1 = arith.cmpi eq, %arg0, %c0_i32 : i32
    %2 = arith.extui %1 : i1 to i32
    %c0_i32_0 = arith.constant 0 : i32
    %3 = arith.cmpi ne, %2, %c0_i32_0 : i32
    scf.if %3 {
      %cst = arith.constant 0.000000e+00 : f32
      %14 = vector.broadcast %cst : f32 to vector<8x128xf32>
      %c0_6 = arith.constant 0 : index
      %c0_7 = arith.constant 0 : index
      %15 = vector.load %arg8[%c0_6, %c0_7] : memref<8x128xf32, #tpu.memory_space<vmem>>, vector<8x128xf32>
      tpu.vector_store %arg8[%c0_6, %c0_7], %14 {strides = array<i32>} : memref<8x128xf32, #tpu.memory_space<vmem>>, vector<8x128xf32>,
      %cst_8 = arith.constant 0.000000e+00 : f32
      %16 = vector.broadcast %cst_8 : f32 to vector<8x128xf32>
      %c0_9 = arith.constant 0 : index
      %c0_10 = arith.constant 0 : index
      %17 = vector.load %arg7[%c0_9, %c0_10] : memref<8x128xf32, #tpu.memory_space<vmem>>, vector<8x128xf32>
      tpu.vector_store %arg7[%c0_9, %c0_10], %16 {strides = array<i32>} : memref<8x128xf32, #tpu.memory_space<vmem>>, vector<8x128xf32>,
    } else {
    }
    %c0_i32_1 = arith.constant 0 : i32
    %4 = arith.cmpi eq, %arg0, %c0_i32_1 : i32
    %c0 = arith.constant 0 : index
    %5 = memref.load %arg1[%c0] : memref<1xi32, #tpu.memory_space<smem>>
    %c0_i32_2 = arith.constant 0 : i32
    %6 = arith.cmpi sgt, %5, %c0_i32_2 : i32
    %7 = arith.andi %4, %6 : i1
    %8 = arith.extui %7 : i1 to i32
    %c0_i32_3 = arith.constant 0 : i32
    %9 = arith.cmpi ne, %8, %c0_i32_3 : i32
    scf.if %9 {
      tpu.enqueue_dma source(%arg6 : memref<128x384xf32, #tpu.memory_space<any>>) target(%arg9 : memref<128x384xf32, #tpu.memory_space<vmem>>) target_semaphore(%arg10 : memref<!tpu.dma_semaphore, #tpu.memory_space<semaphore_mem>>)
    } else {
    }
    %c0_4 = arith.constant 0 : index
    %10 = memref.load %arg1[%c0_4] : memref<1xi32, #tpu.memory_space<smem>>
    %11 = arith.cmpi slt, %0, %10 : i32
    %12 = arith.extui %11 : i1 to i32
    %c0_i32_5 = arith.constant 0 : i32
    %13 = arith.cmpi ne, %12, %c0_i32_5 : i32
    scf.if %13 {
      %c0_i32_6 = arith.constant 0 : i32
      %14 = arith.cmpi eq, %arg0, %c0_i32_6 : i32
      %15 = arith.extui %14 : i1 to i32
      %c0_i32_7 = arith.constant 0 : i32
      %16 = arith.cmpi ne, %15, %c0_i32_7 : i32
      scf.if %16 {
        tpu.wait_dma2 semaphore(%arg10 : memref<!tpu.dma_semaphore, #tpu.memory_space<semaphore_mem>>) src(%arg6 : memref<128x384xf32, #tpu.memory_space<any>>) dst(%arg9 : memref<128x384xf32, #tpu.memory_space<vmem>>)
      } else {
      }
      %c0_8 = arith.constant 0 : index
      %c0_9 = arith.constant 0 : index
      %17 = vector.load %arg4[%c0_8, %c0_9] : memref<8x128xf32, #tpu.memory_space<vmem>>, vector<8x128xf32>
      %c0_10 = arith.constant 0 : index
      %c0_11 = arith.constant 0 : index
      %18 = vector.load %arg5[%c0_10, %c0_11] : memref<1x128xf32, #tpu.memory_space<vmem>>, vector<1x128xf32>
      %c0_12 = arith.constant 0 : index
      %c0_13 = arith.constant 0 : index
      %19 = vector.load %arg2[%c0_12, %c0_13] : memref<8x1xi32, #tpu.memory_space<vmem>>, vector<8x1xi32>
      %c0_14 = arith.constant 0 : index
      %c0_15 = arith.constant 0 : index
      %20 = vector.load %arg9[%c0_14, %c0_15] : memref<128x384xf32, #tpu.memory_space<vmem>>, vector<128x384xf32>
      %c0_16 = arith.constant 0 : index
      %c0_17 = arith.constant 0 : index
      %21 = vector.load %arg8[%c0_16, %c0_17] : memref<8x128xf32, #tpu.memory_space<vmem>>, vector<8x128xf32>
      %c0_i32_18 = arith.constant 0 : i32
      %22 = arith.mulf %21, %17 : vector<8x128xf32>
      %cst = arith.constant dense<0.000000e+00> : vector<8x384xf32>
      %23 = tpu.matmul %22, %20, %cst {dimension_numbers = #tpu.dot_dimension_numbers<[1], [0], [0], [1], [0, 0, 1, 1], [], []>} : vector<8x128xf32>, vector<128x384xf32>, vector<8x384xf32> -> vector<8x384xf32>
      %c8_i32 = arith.constant 8 : i32
      %24 = arith.muli %c0_i32_18, %c8_i32 : i32
      %25 = tpu.assume_multiple %24, 8 : i32
      %c0_19 = arith.constant 0 : index
      %26 = arith.index_cast %25 : i32 to index
      %c0_20 = arith.constant 0 : index
      %27 = vector.load %arg3[%c0_19, %26, %c0_20] : memref<1x32x384xf32, #tpu.memory_space<vmem>>, vector<1x8x384xf32>
      %28 = vector.shape_cast %27 : vector<1x8x384xf32> to vector<8x384xf32>
      %29 = vector.extract_strided_slice %28 {offsets = [0, 0], sizes = [8, 128], strides = [1, 1]} : vector<8x384xf32> to vector<8x128xf32>
      %30 = vector.extract_strided_slice %23 {offsets = [0, 0], sizes = [8, 128], strides = [1, 1]} : vector<8x384xf32> to vector<8x128xf32>
      %31 = arith.addf %29, %30 : vector<8x128xf32>
      %32 = arith.negf %31 : vector<8x128xf32>
      %33 = math.exp %32 : vector<8x128xf32>
      %cst_21 = arith.constant 1.000000e+00 : f32
      %34 = vector.broadcast %cst_21 : f32 to vector<8x128xf32>
      %35 = arith.addf %34, %33 : vector<8x128xf32>
      %36 = arith.divf %34, %35 : vector<8x128xf32>
      %37 = vector.extract_strided_slice %28 {offsets = [0, 128], sizes = [8, 128], strides = [1, 1]} : vector<8x384xf32> to vector<8x128xf32>
      %38 = vector.extract_strided_slice %23 {offsets = [0, 128], sizes = [8, 128], strides = [1, 1]} : vector<8x384xf32> to vector<8x128xf32>
      %39 = arith.addf %37, %38 : vector<8x128xf32>
      %40 = arith.negf %39 : vector<8x128xf32>
      %41 = math.exp %40 : vector<8x128xf32>
      %cst_22 = arith.constant 1.000000e+00 : f32
      %42 = vector.broadcast %cst_22 : f32 to vector<8x128xf32>
      %43 = arith.addf %42, %41 : vector<8x128xf32>
      %44 = arith.divf %42, %43 : vector<8x128xf32>
      %45 = vector.extract_strided_slice %28 {offsets = [0, 256], sizes = [8, 128], strides = [1, 1]} : vector<8x384xf32> to vector<8x128xf32>
      %46 = vector.extract_strided_slice %23 {offsets = [0, 256], sizes = [8, 128], strides = [1, 1]} : vector<8x384xf32> to vector<8x128xf32>
      %47 = vector.broadcast %18 : vector<1x128xf32> to vector<8x128xf32>
      %48 = arith.addf %46, %47 : vector<8x128xf32>
      %49 = arith.mulf %36, %48 : vector<8x128xf32>
      %50 = arith.addf %45, %49 : vector<8x128xf32>
      %51 = math.tanh %50 : vector<8x128xf32>
      %cst_23 = arith.constant 1.000000e+00 : f32
      %52 = vector.broadcast %cst_23 : f32 to vector<8x128xf32>
      %53 = arith.subf %52, %44 : vector<8x128xf32>
      %54 = arith.mulf %53, %51 : vector<8x128xf32>
      %55 = arith.mulf %44, %22 : vector<8x128xf32>
      %56 = arith.addf %54, %55 : vector<8x128xf32>
      %57 = arith.addi %0, %c0_i32_18 : i32
      %58 = vector.broadcast %57 : i32 to vector<8x1xi32>
      %59 = arith.cmpi slt, %58, %19 : vector<8x1xi32>
      %60 = vector.shape_cast %59 : vector<8x1xi1> to vector<8x1xi1>
      %61 = vector.broadcast %60 : vector<8x1xi1> to vector<8x128xi1>
      %62 = arith.select %61, %56, %21 : vector<8x128xi1>, vector<8x128xf32>
      %c1_i32 = arith.constant 1 : i32
      %63 = arith.mulf %62, %17 : vector<8x128xf32>
      %cst_24 = arith.constant dense<0.000000e+00> : vector<8x384xf32>
      %64 = tpu.matmul %63, %20, %cst_24 {dimension_numbers = #tpu.dot_dimension_numbers<[1], [0], [0], [1], [0, 0, 1, 1], [], []>} : vector<8x128xf32>, vector<128x384xf32>, vector<8x384xf32> -> vector<8x384xf32>
      %c8_i32_25 = arith.constant 8 : i32
      %65 = arith.muli %c1_i32, %c8_i32_25 : i32
      %66 = tpu.assume_multiple %65, 8 : i32
      %c0_26 = arith.constant 0 : index
      %67 = arith.index_cast %66 : i32 to index
      %c0_27 = arith.constant 0 : index
      %68 = vector.load %arg3[%c0_26, %67, %c0_27] : memref<1x32x384xf32, #tpu.memory_space<vmem>>, vector<1x8x384xf32>
      %69 = vector.shape_cast %68 : vector<1x8x384xf32> to vector<8x384xf32>
      %70 = vector.extract_strided_slice %69 {offsets = [0, 0], sizes = [8, 128], strides = [1, 1]} : vector<8x384xf32> to vector<8x128xf32>
      %71 = vector.extract_strided_slice %64 {offsets = [0, 0], sizes = [8, 128], strides = [1, 1]} : vector<8x384xf32> to vector<8x128xf32>
      %72 = arith.addf %70, %71 : vector<8x128xf32>
      %73 = arith.negf %72 : vector<8x128xf32>
      %74 = math.exp %73 : vector<8x128xf32>
      %cst_28 = arith.constant 1.000000e+00 : f32
      %75 = vector.broadcast %cst_28 : f32 to vector<8x128xf32>
      %76 = arith.addf %75, %74 : vector<8x128xf32>
      %77 = arith.divf %75, %76 : vector<8x128xf32>
      %78 = vector.extract_strided_slice %69 {offsets = [0, 128], sizes = [8, 128], strides = [1, 1]} : vector<8x384xf32> to vector<8x128xf32>
      %79 = vector.extract_strided_slice %64 {offsets = [0, 128], sizes = [8, 128], strides = [1, 1]} : vector<8x384xf32> to vector<8x128xf32>
      %80 = arith.addf %78, %79 : vector<8x128xf32>
      %81 = arith.negf %80 : vector<8x128xf32>
      %82 = math.exp %81 : vector<8x128xf32>
      %cst_29 = arith.constant 1.000000e+00 : f32
      %83 = vector.broadcast %cst_29 : f32 to vector<8x128xf32>
      %84 = arith.addf %83, %82 : vector<8x128xf32>
      %85 = arith.divf %83, %84 : vector<8x128xf32>
      %86 = vector.extract_strided_slice %69 {offsets = [0, 256], sizes = [8, 128], strides = [1, 1]} : vector<8x384xf32> to vector<8x128xf32>
      %87 = vector.extract_strided_slice %64 {offsets = [0, 256], sizes = [8, 128], strides = [1, 1]} : vector<8x384xf32> to vector<8x128xf32>
      %88 = vector.broadcast %18 : vector<1x128xf32> to vector<8x128xf32>
      %89 = arith.addf %87, %88 : vector<8x128xf32>
      %90 = arith.mulf %77, %89 : vector<8x128xf32>
      %91 = arith.addf %86, %90 : vector<8x128xf32>
      %92 = math.tanh %91 : vector<8x128xf32>
      %cst_30 = arith.constant 1.000000e+00 : f32
      %93 = vector.broadcast %cst_30 : f32 to vector<8x128xf32>
      %94 = arith.subf %93, %85 : vector<8x128xf32>
      %95 = arith.mulf %94, %92 : vector<8x128xf32>
      %96 = arith.mulf %85, %63 : vector<8x128xf32>
      %97 = arith.addf %95, %96 : vector<8x128xf32>
      %98 = arith.addi %0, %c1_i32 : i32
      %99 = vector.broadcast %98 : i32 to vector<8x1xi32>
      %100 = arith.cmpi slt, %99, %19 : vector<8x1xi32>
      %101 = vector.shape_cast %100 : vector<8x1xi1> to vector<8x1xi1>
      %102 = vector.broadcast %101 : vector<8x1xi1> to vector<8x128xi1>
      %103 = arith.select %102, %97, %62 : vector<8x128xi1>, vector<8x128xf32>
      %c2_i32 = arith.constant 2 : i32
      %104 = arith.mulf %103, %17 : vector<8x128xf32>
      %cst_31 = arith.constant dense<0.000000e+00> : vector<8x384xf32>
      %105 = tpu.matmul %104, %20, %cst_31 {dimension_numbers = #tpu.dot_dimension_numbers<[1], [0], [0], [1], [0, 0, 1, 1], [], []>} : vector<8x128xf32>, vector<128x384xf32>, vector<8x384xf32> -> vector<8x384xf32>
      %c8_i32_32 = arith.constant 8 : i32
      %106 = arith.muli %c2_i32, %c8_i32_32 : i32
      %107 = tpu.assume_multiple %106, 8 : i32
      %c0_33 = arith.constant 0 : index
      %108 = arith.index_cast %107 : i32 to index
      %c0_34 = arith.constant 0 : index
      %109 = vector.load %arg3[%c0_33, %108, %c0_34] : memref<1x32x384xf32, #tpu.memory_space<vmem>>, vector<1x8x384xf32>
      %110 = vector.shape_cast %109 : vector<1x8x384xf32> to vector<8x384xf32>
      %111 = vector.extract_strided_slice %110 {offsets = [0, 0], sizes = [8, 128], strides = [1, 1]} : vector<8x384xf32> to vector<8x128xf32>
      %112 = vector.extract_strided_slice %105 {offsets = [0, 0], sizes = [8, 128], strides = [1, 1]} : vector<8x384xf32> to vector<8x128xf32>
      %113 = arith.addf %111, %112 : vector<8x128xf32>
      %114 = arith.negf %113 : vector<8x128xf32>
      %115 = math.exp %114 : vector<8x128xf32>
      %cst_35 = arith.constant 1.000000e+00 : f32
      %116 = vector.broadcast %cst_35 : f32 to vector<8x128xf32>
      %117 = arith.addf %116, %115 : vector<8x128xf32>
      %118 = arith.divf %116, %117 : vector<8x128xf32>
      %119 = vector.extract_strided_slice %110 {offsets = [0, 128], sizes = [8, 128], strides = [1, 1]} : vector<8x384xf32> to vector<8x128xf32>
      %120 = vector.extract_strided_slice %105 {offsets = [0, 128], sizes = [8, 128], strides = [1, 1]} : vector<8x384xf32> to vector<8x128xf32>
      %121 = arith.addf %119, %120 : vector<8x128xf32>
      %122 = arith.negf %121 : vector<8x128xf32>
      %123 = math.exp %122 : vector<8x128xf32>
      %cst_36 = arith.constant 1.000000e+00 : f32
      %124 = vector.broadcast %cst_36 : f32 to vector<8x128xf32>
      %125 = arith.addf %124, %123 : vector<8x128xf32>
      %126 = arith.divf %124, %125 : vector<8x128xf32>
      %127 = vector.extract_strided_slice %110 {offsets = [0, 256], sizes = [8, 128], strides = [1, 1]} : vector<8x384xf32> to vector<8x128xf32>
      %128 = vector.extract_strided_slice %105 {offsets = [0, 256], sizes = [8, 128], strides = [1, 1]} : vector<8x384xf32> to vector<8x128xf32>
      %129 = vector.broadcast %18 : vector<1x128xf32> to vector<8x128xf32>
      %130 = arith.addf %128, %129 : vector<8x128xf32>
      %131 = arith.mulf %118, %130 : vector<8x128xf32>
      %132 = arith.addf %127, %131 : vector<8x128xf32>
      %133 = math.tanh %132 : vector<8x128xf32>
      %cst_37 = arith.constant 1.000000e+00 : f32
      %134 = vector.broadcast %cst_37 : f32 to vector<8x128xf32>
      %135 = arith.subf %134, %126 : vector<8x128xf32>
      %136 = arith.mulf %135, %133 : vector<8x128xf32>
      %137 = arith.mulf %126, %104 : vector<8x128xf32>
      %138 = arith.addf %136, %137 : vector<8x128xf32>
      %139 = arith.addi %0, %c2_i32 : i32
      %140 = vector.broadcast %139 : i32 to vector<8x1xi32>
      %141 = arith.cmpi slt, %140, %19 : vector<8x1xi32>
      %142 = vector.shape_cast %141 : vector<8x1xi1> to vector<8x1xi1>
      %143 = vector.broadcast %142 : vector<8x1xi1> to vector<8x128xi1>
      %144 = arith.select %143, %138, %103 : vector<8x128xi1>, vector<8x128xf32>
      %c3_i32 = arith.constant 3 : i32
      %145 = arith.mulf %144, %17 : vector<8x128xf32>
      %cst_38 = arith.constant dense<0.000000e+00> : vector<8x384xf32>
      %146 = tpu.matmul %145, %20, %cst_38 {dimension_numbers = #tpu.dot_dimension_numbers<[1], [0], [0], [1], [0, 0, 1, 1], [], []>} : vector<8x128xf32>, vector<128x384xf32>, vector<8x384xf32> -> vector<8x384xf32>
      %c8_i32_39 = arith.constant 8 : i32
      %147 = arith.muli %c3_i32, %c8_i32_39 : i32
      %148 = tpu.assume_multiple %147, 8 : i32
      %c0_40 = arith.constant 0 : index
      %149 = arith.index_cast %148 : i32 to index
      %c0_41 = arith.constant 0 : index
      %150 = vector.load %arg3[%c0_40, %149, %c0_41] : memref<1x32x384xf32, #tpu.memory_space<vmem>>, vector<1x8x384xf32>
      %151 = vector.shape_cast %150 : vector<1x8x384xf32> to vector<8x384xf32>
      %152 = vector.extract_strided_slice %151 {offsets = [0, 0], sizes = [8, 128], strides = [1, 1]} : vector<8x384xf32> to vector<8x128xf32>
      %153 = vector.extract_strided_slice %146 {offsets = [0, 0], sizes = [8, 128], strides = [1, 1]} : vector<8x384xf32> to vector<8x128xf32>
      %154 = arith.addf %152, %153 : vector<8x128xf32>
      %155 = arith.negf %154 : vector<8x128xf32>
      %156 = math.exp %155 : vector<8x128xf32>
      %cst_42 = arith.constant 1.000000e+00 : f32
      %157 = vector.broadcast %cst_42 : f32 to vector<8x128xf32>
      %158 = arith.addf %157, %156 : vector<8x128xf32>
      %159 = arith.divf %157, %158 : vector<8x128xf32>
      %160 = vector.extract_strided_slice %151 {offsets = [0, 128], sizes = [8, 128], strides = [1, 1]} : vector<8x384xf32> to vector<8x128xf32>
      %161 = vector.extract_strided_slice %146 {offsets = [0, 128], sizes = [8, 128], strides = [1, 1]} : vector<8x384xf32> to vector<8x128xf32>
      %162 = arith.addf %160, %161 : vector<8x128xf32>
      %163 = arith.negf %162 : vector<8x128xf32>
      %164 = math.exp %163 : vector<8x128xf32>
      %cst_43 = arith.constant 1.000000e+00 : f32
      %165 = vector.broadcast %cst_43 : f32 to vector<8x128xf32>
      %166 = arith.addf %165, %164 : vector<8x128xf32>
      %167 = arith.divf %165, %166 : vector<8x128xf32>
      %168 = vector.extract_strided_slice %151 {offsets = [0, 256], sizes = [8, 128], strides = [1, 1]} : vector<8x384xf32> to vector<8x128xf32>
      %169 = vector.extract_strided_slice %146 {offsets = [0, 256], sizes = [8, 128], strides = [1, 1]} : vector<8x384xf32> to vector<8x128xf32>
      %170 = vector.broadcast %18 : vector<1x128xf32> to vector<8x128xf32>
      %171 = arith.addf %169, %170 : vector<8x128xf32>
      %172 = arith.mulf %159, %171 : vector<8x128xf32>
      %173 = arith.addf %168, %172 : vector<8x128xf32>
      %174 = math.tanh %173 : vector<8x128xf32>
      %cst_44 = arith.constant 1.000000e+00 : f32
      %175 = vector.broadcast %cst_44 : f32 to vector<8x128xf32>
      %176 = arith.subf %175, %167 : vector<8x128xf32>
      %177 = arith.mulf %176, %174 : vector<8x128xf32>
      %178 = arith.mulf %167, %145 : vector<8x128xf32>
      %179 = arith.addf %177, %178 : vector<8x128xf32>
      %180 = arith.addi %0, %c3_i32 : i32
      %181 = vector.broadcast %180 : i32 to vector<8x1xi32>
      %182 = arith.cmpi slt, %181, %19 : vector<8x1xi32>
      %183 = vector.shape_cast %182 : vector<8x1xi1> to vector<8x1xi1>
      %184 = vector.broadcast %183 : vector<8x1xi1> to vector<8x128xi1>
      %185 = arith.select %184, %179, %144 : vector<8x128xi1>, vector<8x128xf32>
      %c4_i32_45 = arith.constant 4 : i32
      %c0_46 = arith.constant 0 : index
      %c0_47 = arith.constant 0 : index
      %186 = vector.load %arg8[%c0_46, %c0_47] : memref<8x128xf32, #tpu.memory_space<vmem>>, vector<8x128xf32>
      tpu.vector_store %arg8[%c0_46, %c0_47], %185 {strides = array<i32>} : memref<8x128xf32, #tpu.memory_space<vmem>>, vector<8x128xf32>,
      %c2_i32_48 = arith.constant 2 : i32
      %187 = arith.cmpi eq, %arg0, %c2_i32_48 : i32
      %c4_i32_49 = arith.constant 4 : i32
      %188 = arith.addi %0, %c4_i32_49 : i32
      %c0_50 = arith.constant 0 : index
      %189 = memref.load %arg1[%c0_50] : memref<1xi32, #tpu.memory_space<smem>>
      %190 = arith.cmpi sge, %188, %189 : i32
      %191 = arith.ori %187, %190 : i1
      %192 = arith.extui %191 : i1 to i32
      %c0_i32_51 = arith.constant 0 : i32
      %193 = arith.cmpi ne, %192, %c0_i32_51 : i32
      scf.if %193 {
        %c0_52 = arith.constant 0 : index
        %c0_53 = arith.constant 0 : index
        %194 = vector.load %arg7[%c0_52, %c0_53] : memref<8x128xf32, #tpu.memory_space<vmem>>, vector<8x128xf32>
        tpu.vector_store %arg7[%c0_52, %c0_53], %185 {strides = array<i32>} : memref<8x128xf32, #tpu.memory_space<vmem>>, vector<8x128xf32>,
      } else {
      }
    } else {
    }
    return
  }
  func.func @transform_0(%arg0: i32, %arg1: memref<1xi32, #tpu.memory_space<smem>>) -> (i32, i32) {
    %c0_i32 = arith.constant 0 : i32
    %c0_i32_0 = arith.constant 0 : i32
    %c0_i32_1 = arith.constant 0 : i32
    return %c0_i32, %c0_i32_0 : i32, i32
  }
  func.func @transform_1(%arg0: i32, %arg1: memref<1xi32, #tpu.memory_space<smem>>) -> (i32, i32, i32) {
    %c0_i32 = arith.constant 0 : i32
    %c0_i32_0 = arith.constant 0 : i32
    %c0_i32_1 = arith.constant 0 : i32
    return %arg0, %c0_i32, %c0_i32_0 : i32, i32, i32
  }
  func.func @transform_2(%arg0: i32, %arg1: memref<1xi32, #tpu.memory_space<smem>>) -> (i32, i32) {
    %c0_i32 = arith.constant 0 : i32
    %c0_i32_0 = arith.constant 0 : i32
    %c0_i32_1 = arith.constant 0 : i32
    return %c0_i32, %c0_i32_0 : i32, i32
  }
  func.func @transform_3(%arg0: i32, %arg1: memref<1xi32, #tpu.memory_space<smem>>) -> (i32, i32) {
    %c0_i32 = arith.constant 0 : i32
    %c0_i32_0 = arith.constant 0 : i32
    %c0_i32_1 = arith.constant 0 : i32
    return %c0_i32, %c0_i32_0 : i32, i32
  }
  func.func @transform_5(%arg0: i32, %arg1: memref<1xi32, #tpu.memory_space<smem>>) -> (i32, i32) {
    %c0_i32 = arith.constant 0 : i32
    %c0_i32_0 = arith.constant 0 : i32
    %c0_i32_1 = arith.constant 0 : i32
    return %c0_i32, %c0_i32_0 : i32, i32
  }
}

</mosaic_0001>

<bundles_post_ra>
// kernel: tpu_custom_call.1
= control target key start
LH: loop header
LB: loop body
LE: loop exit
PB: predicated region body
PF: predicated region fallthrough
CT: control target
= control target key end

     0   :  { %s2269_s0 = inlined_call_operand.<no memory space> [shape: s32[1], index: 0, kind: input, shape index: {}]   ;;  %s2270_s1 = inlined_call_operand.vmem [shape: s32[8,1], index: 1, kind: input, shape index: {}]   ;;  %s2271_s2 = inlined_call_operand.hbm [shape: f32[3,32,384], index: 2, kind: input, shape index: {}]   ;;  %s2272_s3 = inlined_call_operand.vmem [shape: f32[8,128], index: 3, kind: input, shape index: {}]   ;;  %s2273_s4 = inlined_call_operand.vmem [shape: f32[1,128], index: 4, kind: input, shape index: {}]   ;;  %s2274_s5 = inlined_call_operand.hbm [shape: f32[128,384], index: 5, kind: input, shape index: {}]   ;;  %s2275_s6 = inlined_call_operand.hbm [shape: f32[8,128], index: 6, kind: output, shape index: {}]  }
   0x1   :  { %11 = sst [smem:[#allocation6]] %s2269_s0 }
   0x2   :  { %12 = vsyncpa [#allocation8], 0 }
   0x3   :  { %14 = vsyncpa [#allocation8 + $0x1], 0 }
   0x4   :  { %15 = vsyncpa [#allocation9], 0  ;;  %s1836_s23 = smov 0   ;;  %s1838_s24 = smov 0  }
   0x5   :  { %s1840_s25 = smov 0   ;;  %s1842_s26 = smov 0  }
   0x6 LB: > { %s1855_s0 = sadd.s32 4294967295, %s1786_s26   ;;  %s1858_s27 = sadd.s32 1, %s1786_s26   ;;  %s1786_s26 = sphi %s1842_s26, %s2288_s26   ;;  %s1782_s25 = sphi %s1840_s25, %s2287_s25   ;;  %s1778_s24 = sphi %s1838_s24, %s2286_s24   ;;  %s1774_s23 = sphi %s1836_s23, %s2285_s23  }
   0x7   : > { %s46_s28 = ssub.s32 %s1786_s26, %s1858_s27  ;;  %s49_s29 = sadd.s32 1, %s1782_s25 }
   0x8   : > { %p47_p0 = scmp.eq.s32.totalorder %s46_s28, 0  ;;  %p56_p1 = scmp.ne.s32.totalorder %s1782_s25, %s1778_s24 }
   0x9   : > { %p57_p2 = scmp.eq.s32.totalorder %s1786_s26, 0  ;;  %p62_p3 = scmp.ne.s32.totalorder %s1778_s24, %s1774_s23 }
   0xa   : > { %s1868_s30 = scalar_select %p47_p0, %s1782_s25, %s49_s29  }
   0xb   : > { %p58_p4 = por %p57_p2, %p56_p1  ;;  %p2276_p5 = scmp.eq.s32.totalorder %s1855_s0, 0 }
   0xc   : > { %p1573_p6 = scmp.lt.s32.totalorder %s1786_s26, 3  ;;  %s158_s8 = sand.u32 1, %s1782_s25  }
   0xd   : > { %p1874_p7 = por %p2276_p5, %p62_p3  ;;  %s1556_s9 = smul.u32 96, %s158_s8 }
   0xe   : > { %s1557_s10 = smul.u32 1536, %s1786_s26  ;;  %p1880_p8 = pnand %p1573_p6, %p58_p4 }
   0xf   : > { %s162_s15 = scalar_lea.vmem [#allocation7], %s1556_s9  ;;  %s1892_s17 = scalar_lea.sflag [#allocation8], %s158_s8 }
  0x10   : > { %s1887_s14 = scalar_lea.hbm %s2271_s2, %s1557_s10  ;;  %s169_s16 = sshll.u32 %s162_s15, 4  ;;  %s1889_s16 = int_to_ptr.vmem [resolvable:$true] %s169_s16 }
  0x11   : > { %s1660_s18 = scalar_lea.hbm %s1887_s14, 1536  ;;  %p1662_p11 = pneg %p1880_p8 }
  0x12   : > { %p1661_p10 = scmp.ne.s32.totalorder %s1887_s14, %s1660_s18  ;;  %s1665_s21 = scalar_lea.hbm %s2271_s2, 4608 }
  0x13   : > { %p1666_p0 = scmp.lt.u32.totalorder %s1887_s14, %s2271_s2  ;;  %p1667_p1 = scmp.lt.u32.totalorder %s1665_s21, %s1660_s18 }
  0x14   : > { %p1663_p12 = pnand %p1662_p11, %p1661_p10  ;;  %p1669_p3 = scmp.lt.u32.totalorder %s1660_s18, %s1887_s14 }
  0x15   : > { %p1668_p2 = por %p1667_p1, %p1666_p0 }
  0x16   : > { %p1664_p13 = pneg %p1663_p12 }
  0x17   : > { %p1670_p4 = por %p1669_p3, %p1668_p2 }
  0x19   : > { %p1671_p6 = pnand %p1670_p4, %p1664_p13 }
  0x1b   : > { %1674 = shalt.err (!%p1671_p6)
}
  0x1c   : > { %s1675_s28 = scalar_lea.vmem %s1889_s16, 1536  ;;  %s1788_s29 = smov [#allocation7]  }
  0x1d   : > { %p1676_p10 = scmp.ne.s32.totalorder %s1889_s16, %s1675_s28  ;;  %s1680_s8 = sshll.u32 %s1788_s29, 4  ;;  %s1681_s8 = int_to_ptr.vmem [resolvable:$false] %s1680_s8 }
  0x1e   : > { %s1682_s9 = scalar_lea.vmem %s1681_s8, 3072  ;;  %p1683_p9 = scmp.lt.s32.totalorder %s1889_s16, %s1681_s8 }
  0x1f   : > { %p1678_p12 = pnand %p1676_p10, %p1662_p11  ;;  %p1684_p0 = scmp.lt.s32.totalorder %s1682_s9, %s1675_s28 }
  0x21   : > { %p1679_p5 = pneg %p1678_p12  ;;  %p1685_p1 = por %p1684_p0, %p1683_p9 }
  0x23   : > { %p1686_p2 = pnand %p1685_p1, %p1679_p5 }
  0x25   : > { %1689 = shalt.err (!%p1686_p2)
}
  0x26   : > { %s1789_s10 = smov 384   ;;  %s1790_s12 = smov 24  }
  0x27   : > { %1572 = dma.hbm_to_vmem [thread:$0]  (!%p1880_p8), %s1887_s14, 1536, %s1889_s16, %s1892_s17, %s1789_s10, %s1789_s10, %s1790_s12  }
  0x28   : > { %p177_p11 = scmp.lt.s32.totalorder %s1786_s26, 4  ;;  %p2279_p13 = scmp.ge.s32.totalorder %s1786_s26, 1 }
  0x2a   : > { %p178_p3 = pnand %p2279_p13, %p177_p11 }
  0x2b   : > { %s183_s13 = sand.u32 (!%p178_p3), 1, %s1778_s24  }
  0x2c   : > { %181 = sbr.rel (%p178_p3) target bundleno = 1209 (0x4b9), region = 36  ;;  %s184_s18 = scalar_lea.sflag (!%p178_p3), [#allocation8], %s183_s13 }
  0x2d   : > { %s1558_s15 = smul.u32 (!%p178_p3), 96, %s183_s13 }
  0x2f   : > { %s1924_s19 = scalar_lea.vmem (!%p178_p3), [#allocation7], %s1558_s15 }
  0x33   : > { %1761 = dma.done.wait (%p1874_p7), %s184_s18, 1536  }
  0x34   : > { %1763 = vsyncadd (%p1874_p7), %s184_s18, 4294965760  ;;  %s1931_s20 = sshll.u32 %s1855_s0, 2  ;;  %p1098_p5 = scmp.ne.s32.totalorder %s1855_s0, 0 }
  0x35   : > { %v1791_v0 = vmov (!%p1098_p5), 0.0  }
  0x36   : > { %211 = sbr.rel (%p1098_p5) target bundleno = 61 (0x3d), region = 44  ;;  %212 = vst [vmem:[#allocation2] sm:$0xff] (!%p1098_p5), %v1791_v0  ;;  %213 = vst [vmem:[#allocation10] sm:$0xff] (!%p1098_p5), %v1791_v0 }
  0x3d PF: > { %s214_s26 = sld [smem:[#allocation6]]  ;;  %s1792_s11 = smov [#allocation3]  }
  0x3e   : > { %s227_s14 = sshll.u32 %s1792_s11, 4  ;;  %p2280_p9 = scmp.eq.s32.totalorder %s1855_s0, 0  ;;  %s228_s14 = int_to_ptr.vmem [resolvable:$true] %s227_s14 }
  0x3f   : > { %s1690_s21 = scalar_lea.hbm %s2274_s5, 6144 }
  0x40   : > { %p1691_p7 = scmp.ne.s32.totalorder %s2274_s5, %s1690_s21  ;;  %p1697_p0 = scmp.lt.u32.totalorder %s1690_s21, %s2274_s5 }
  0x43   : > { %p215_p8 = scmp.gt.s32.totalorder %s214_s26, 0 }
  0x45   : > { %p1936_p4 = pnand %p215_p8, %p2280_p9 }
  0x47   : > { %p1692_p6 = pneg %p1936_p4 }
  0x49   : > { %p1693_p10 = pnand %p1692_p6, %p1691_p7 }
  0x4b   : > { %p1694_p12 = pneg %p1693_p10 }
  0x4d   : > { %p1699_p1 = pnand %p1697_p0, %p1694_p12 }
  0x4f   : > { %1702 = shalt.err (!%p1699_p1)  }
  0x50   : > { %s1703_s8 = scalar_lea.vmem %s228_s14, 6144  ;;  %p1711_p3 = scmp.lt.s32.totalorder %s228_s14, %s228_s14 }
  0x51   : > { %p1704_p2 = scmp.ne.s32.totalorder %s228_s14, %s1703_s8  ;;  %p1712_p5 = scmp.lt.s32.totalorder %s1703_s8, %s1703_s8 }
  0x53   : > { %p1706_p11 = pnand %p1704_p2, %p1692_p6  ;;  %p1713_p8 = por %p1712_p5, %p1711_p3 }
  0x55   : > { %p1707_p13 = pneg %p1706_p11 }
  0x57   : > { %p1714_p9 = pnand %p1713_p8, %p1707_p13 }
  0x59   : > { %1717 = shalt.err (!%p1714_p9)  }
  0x5a   : > { %1562 = dma.hbm_to_vmem [thread:$0]  (!%p1936_p4), %s2274_s5, 6144, %s228_s14, [#allocation4] }
  0x5b   : > { %p1099_p7 = scmp.ge.s32.totalorder %s1931_s20, %s214_s26 }
  0x5c   : > { %p2282_p10 = scmp.eq.s32.totalorder (!%p1099_p7), %s1855_s0, 0 }
  0x5d   : > { %235 = sbr.rel (%p1099_p7) target bundleno = 1184 (0x4a0), region = 56 }
  0x64   : > { %1765 = dma.done.wait (%p2282_p10), [#allocation4], 6144  ;;  %p2283_p6 = pmov %p2282_p10 }
  0x65   : > { %s1019_s12 = sld [smem:[#allocation6]]  ;;  %v1793_v1 = vmov 0.0|0.0   ;;  %v1794_v2 = vmov 0.0   ;;  %vm1795_vm0 = vmmov 0   ;;  %v1796_v3 = vmov 0   ;;  %s1018_s13 = sadd.s32 4, %s1931_s20 }
  0x66   : > { %1767 = vsyncadd (%p2283_p6), [#allocation4], 4294961152  ;;  %1364 = vmatprep.subr.bf16.mxu1 %v1793_v1  ;;  %360 = vmatprep.mubr.f32.mxu0 %v1794_v2  ;;  %p1017_p4 = scmp.eq.s32.totalorder %s1855_s0, 2  ;;  %v247_v4 = vld [vmem:[#allocation3 + $0x8] sm:$0xff]  ;;  %v250_v5 = vld [vmem:[#allocation3 + $0x20] sm:$0xff]  ;;  %s649_s18 = sadd.s32 1, %s1931_s20  ;;  %v471_v43 = vstv %s1931_s20 }
  0x67   : > { %1224 = vmatprep.mubr.msk.f32.mxu1 %vm1795_vm0, %v1794_v2  ;;  %1618 = vset.pattern.permute.xlu0 %v1796_v3  ;;  %v246_v6 = vld [vmem:[#allocation3] sm:$0xff]  ;;  %v1969_v7 = vpack.c.bf16 %v250_v5, %v247_v4  ;;  %v249_v8 = vld [vmem:[#allocation3 + $0x18] sm:$0xff]  ;;  %v256_v10 = vld [vmem:[#allocation3 + $0x50] sm:$0xff]  ;;  %v650_v44 = vstv %s649_s18  ;;  %s828_s21 = sadd.s32 2, %s1931_s20  ;;  %s1007_s22 = sadd.s32 3, %s1931_s20 }
  0x68   : > { %1619 = vset.pattern.permute.xlu1 %v1796_v3  ;;  %v253_v9 = vld [vmem:[#allocation3 + $0x38] sm:$0xff]  ;;  %v1975_v11 = vpack.c.bf16 %v249_v8, %v246_v6  ;;  %v252_v13 = vld [vmem:[#allocation3 + $0x30] sm:$0xff]  ;;  %v255_v14 = vld [vmem:[#allocation3 + $0x48] sm:$0xff] }
  0x69   : > { %v1977_v12 = vpack.c.bf16 %v256_v10, %v253_v9  ;;  %v259_v15 = vld [vmem:[#allocation3 + $0x68] sm:$0xff]  ;;  %1333 = vmatprep.subr.bf16.mxu0 %v1969_v7  ;;  %v262_v16 = vld [vmem:[#allocation3 + $0x80] sm:$0xff]  ;;  %v1981_v17 = vpack.c.bf16 %v255_v14, %v252_v13  ;;  %v261_v20 = vld [vmem:[#allocation3 + $0x78] sm:$0xff] }
  0x6a   : > { %1335 = vmatpush1.bf16.msra.mxu0 %v1975_v11  ;;  %v1984_v18 = vpack.c.bf16 %v262_v16, %v259_v15  ;;  %v258_v19 = vld [vmem:[#allocation3 + $0x60] sm:$0xff]  ;;  %v265_v21 = vld [vmem:[#allocation3 + $0x98] sm:$0xff]  ;;  %v268_v22 = vld [vmem:[#allocation3 + $0xb0] sm:$0xff] }
  0x6b   : > { %p1020_p12 = scmp.ge.s32.totalorder %s1018_s13, %s1019_s12  ;;  %1337 = vmatprep.subr.bf16.mxu0 %v1977_v12  ;;  %v1987_v23 = vpack.c.bf16 %v261_v20, %v258_v19  ;;  %v264_v24 = vld [vmem:[#allocation3 + $0x90] sm:$0xff]  ;;  %v1990_v25 = vpack.c.bf16 %v268_v22, %v265_v21  ;;  %v267_v26 = vld [vmem:[#allocation3 + $0xa8] sm:$0xff]  ;;  %v274_v30 = vld [vmem:[#allocation3 + $0xe0] sm:$0xff] }
  0x6c   : > { %v248_v27 = vld [vmem:[#allocation3 + $0x10] sm:$0xff]  ;;  %v251_v28 = vld [vmem:[#allocation3 + $0x28] sm:$0xff]  ;;  %v254_v32 = vld [vmem:[#allocation3 + $0x40] sm:$0xff]  ;;  %v1996_v34 = vpack.c.bf16 %v267_v26, %v264_v24 }
  0x6d   : > { %p1971_p0 = por %p1020_p12, %p1017_p4  ;;  %v271_v29 = vld [vmem:[#allocation3 + $0xc8] sm:$0xff]  ;;  %v1992_v31 = vpack.c.bf16 %v251_v28, %v248_v27  ;;  %v257_v33 = vld [vmem:[#allocation3 + $0x58] sm:$0xff]  ;;  %v270_v35 = vld [vmem:[#allocation3 + $0xc0] sm:$0xff] }
  0x6e   : > { %1339 = vmatpush1.bf16.msra.mxu0 %v1981_v17  ;;  %v1999_v36 = vpack.c.bf16 %v257_v33, %v254_v32  ;;  %v2002_v37 = vpack.c.bf16 %v274_v30, %v271_v29  ;;  %v273_v38 = vld [vmem:[#allocation3 + $0xd8] sm:$0xff]  ;;  %v260_v39 = vld [vmem:[#allocation3 + $0x70] sm:$0xff]  ;;  %v263_v40 = vld [vmem:[#allocation3 + $0x88] sm:$0xff] }
  0x6f   : > { %1341 = vmatprep.subr.bf16.mxu0 %v1984_v18  ;;  %1366 = vmatpush3.bf16.msra.mxu1 %v1992_v31  ;;  %v277_v41 = vld [vmem:[#allocation3 + $0xf8] sm:$0xff]  ;;  %v280_v42 = vld [vmem:[#allocation3 + $0x110] sm:$0xff]  ;;  %v2007_v45 = vpack.c.bf16 %v273_v38, %v270_v35  ;;  %v2010_v47 = vpack.c.bf16 %v263_v40, %v260_v39  ;;  %v279_v50 = vld [vmem:[#allocation3 + $0x108] sm:$0xff] }
  0x70   : > { %1367 = vmatprep.subr.bf16.mxu1 %v1793_v1  ;;  %v276_v46 = vld [vmem:[#allocation3 + $0xf0] sm:$0xff]  ;;  %v2015_v48 = vld [vmem:[%s2270_s1] sm:$0xff]  ;;  %v2018_v49 = vpack.c.bf16 %v280_v42, %v277_v41  ;;  %v266_v51 = vld [vmem:[#allocation3 + $0xa0] sm:$0xff] }
  0x71   : > { %v269_v52 = vld [vmem:[#allocation3 + $0xb8] sm:$0xff]  ;;  %vm472_vm1 = vcmp.lt.s32.totalorder %v471_v43, %v2015_v48  ;;  %vm651_vm2 = vcmp.lt.s32.totalorder %v650_v44, %v2015_v48  ;;  %v283_v53 = vld [vmem:[#allocation3 + $0x128] sm:$0xff]  ;;  %v286_v54 = vld [vmem:[#allocation3 + $0x140] sm:$0xff]  ;;  %v2025_v56 = vpack.c.bf16 %v279_v50, %v276_v46 }
  0x72   : > { %1343 = vmatpush1.bf16.msra.mxu0 %v1987_v23  ;;  %v473_v55 = vsel %vm472_vm1, 1, %v1796_v3  ;;  %v282_v57 = vld [vmem:[#allocation3 + $0x120] sm:$0xff]  ;;  %v2028_v58 = vpack.c.bf16 %v269_v52, %v266_v51  ;;  %v652_v59 = vsel %vm651_vm2, 1, %v1796_v3  ;;  %v2032_v60 = vpack.c.bf16 %v286_v54, %v283_v53  ;;  %v285_v61 = vld [vmem:[#allocation3 + $0x138] sm:$0xff]  ;;  %v272_v62 = vld [vmem:[#allocation3 + $0xd0] sm:$0xff] }
  0x73   : > { %1345 = vmatprep.subr.bf16.mxu0 %v1990_v25  ;;  %1369 = vmatpush3.bf16.msra.mxu1 %v1999_v36  ;;  %v275_v63 = vld [vmem:[#allocation3 + $0xe8] sm:$0xff]  ;;  %v289_v0 = vld [vmem:[#allocation3 + $0x158] sm:$0xff]  ;;  %v292_v4 = vld [vmem:[#allocation3 + $0x170] sm:$0xff]  ;;  %v2036_v5 = vpack.c.bf16 %v285_v61, %v282_v57 }
  0x74   : > { %1370 = vmatprep.subr.bf16.mxu1 %v1793_v1  ;;  %475 = vperm.xlu0 %1618, %v473_v55   ;;  %v288_v6 = vld [vmem:[#allocation3 + $0x150] sm:$0xff]  ;;  %v2039_v8 = vpack.c.bf16 %v275_v63, %v272_v62  ;;  %v2042_v9 = vpack.c.bf16 %v292_v4, %v289_v0  ;;  %v291_v10 = vld [vmem:[#allocation3 + $0x168] sm:$0xff]  ;;  %v278_v13 = vld [vmem:[#allocation3 + $0x100] sm:$0xff] }
  0x75   : > { %v281_v14 = vld [vmem:[#allocation3 + $0x118] sm:$0xff]  ;;  %v2046_v15 = vpack.c.bf16 %v291_v10, %v288_v6  ;;  %v284_v21 = vld [vmem:[#allocation3 + $0x130] sm:$0xff]  ;;  %v287_v22 = vld [vmem:[#allocation3 + $0x148] sm:$0xff] }
  0x76   : > { %1347 = vmatpush1.bf16.msra.mxu0 %v1996_v34  ;;  %v2051_v16 = vld [vmem:[%s2272_s3] sm:$0xff]  ;;  %v2056_v20 = vpack.c.bf16 %v281_v14, %v278_v13  ;;  %v2066_v26 = vpack.c.bf16 %v287_v22, %v284_v21  ;;  %v290_v27 = vld [vmem:[#allocation3 + $0x160] sm:$0xff]  ;;  %v441_v38 = vld [vmem:[%s1924_s19 + $0x8] sm:$0xff]  ;;  %v1008_v21 = vstv %s1007_s22 }
  0x77   : > { %1349 = vmatprep.subr.bf16.mxu0 %v2002_v37  ;;  %1372 = vmatpush3.bf16.msra.mxu1 %v2010_v47  ;;  %v2053_v19 = vld [vmem:[#allocation2] sm:$0xff]  ;;  %v440_v30 = vld [vmem:[%s1924_s19] sm:$0xff]  ;;  %v442_v55 = vld [vmem:[%s1924_s19 + $0x10] sm:$0xff]  ;;  %vm1009_vm5 = vcmp.lt.s32.totalorder %v1008_v21, %v2015_v48 }
  0x78   : > { %1373 = vmatprep.subr.bf16.mxu1 %v1793_v1  ;;  %654 = vperm.xlu0 %1618, %v652_v59   ;;  %v2062_v24 = vmul.f32 %v2053_v19, %v2051_v16  ;;  %v293_v28 = vld [vmem:[#allocation3 + $0x178] sm:$0xff] }
  0x79   : > { %v2072_v29 = vpack.c.bf16 %v293_v28, %v290_v27  ;;  %v2118_v51 = vld [vmem:[%s2273_s4] ss:$0 sm:$0xff] }
  0x7a   : > { %1351 = vmatpush1.bf16.msra.mxu0 %v2007_v45  ;;  %v1104_v27 = vld [vmem:[%s1924_s19 + $0x18] sm:$0xff] }
  0x7b   : > { %1353 = vmatprep.subr.bf16.mxu0 %v2018_v49  ;;  %1375 = vmatpush3.bf16.msra.mxu1 %v2028_v58 }
  0x7c   : > { %1376 = vmatprep.subr.bf16.mxu1 %v1793_v1 }
  0x7e   : > { %1355 = vmatpush1.bf16.msra.mxu0 %v2025_v56 }
  0x7f   : > { %1357 = vmatprep.subr.bf16.mxu0 %v2032_v60  ;;  %1378 = vmatpush3.bf16.msra.mxu1 %v2039_v8 }
  0x80   : > { %1379 = vmatprep.subr.bf16.mxu1 %v1793_v1 }
  0x82   : > { %1359 = vmatpush1.bf16.msra.mxu0 %v2036_v5 }
  0x83   : > { %1361 = vmatprep.subr.bf16.mxu0 %v2042_v9  ;;  %1381 = vmatpush3.bf16.msra.mxu1 %v2056_v20 }
  0x84   : > { %1382 = vmatprep.subr.bf16.mxu1 %v1793_v1 }
  0x86   : > { %1363 = vmatpush1.bf16.msra.mxu0 %v2046_v15 }
  0x87   : > { %1389 = vmatprep.subr.bf16.mxu0 %v1969_v7  ;;  %1384 = vmatpush3.bf16.msra.mxu1 %v2066_v26 }
  0x88   : > { %1385 = vmatprep.subr.bf16.mxu1 %v1793_v1 }
  0x89   : > { %361 = vmatmul.mubr.f32.vlgmr.msra.gmra.mrb[0].mxu0 %v2062_v24 }
  0x8a   : > { %1391 = vmatpush1.bf16.msra.mxu0 %v1975_v11  ;;  %544 = vmatprep.mubr.f32.mxu0 %v1794_v2 }
  0x8b   : > { %1393 = vmatprep.subr.bf16.mxu0 %v1977_v12  ;;  %1387 = vmatpush3.bf16.msra.mxu1 %v2072_v29 }
  0x8c   : > { %1420 = vmatprep.subr.bf16.mxu1 %v1793_v1 }
  0x8e   : > { %1395 = vmatpush1.bf16.msra.mxu0 %v1981_v17  ;;  %1225 = vmatmul.mubr.f32.vlgmr.msra.gmra.mrb[0].mxu1 %v2062_v24 }
  0x8f   : > { %1397 = vmatprep.subr.bf16.mxu0 %v1984_v18  ;;  %1422 = vmatpush3.bf16.msra.mxu1 %v1992_v31 }
  0x90   : > { %1423 = vmatprep.subr.bf16.mxu1 %v1793_v1  ;;  %1259 = vmatprep.mubr.msk.f32.mxu1 %vm1795_vm0, %v1794_v2 }
  0x92   : > { %1399 = vmatpush1.bf16.msra.mxu0 %v1987_v23 }
  0x93   : > { %1401 = vmatprep.subr.bf16.mxu0 %v1990_v25  ;;  %1425 = vmatpush3.bf16.msra.mxu1 %v1999_v36 }
  0x94   : > { %1426 = vmatprep.subr.bf16.mxu1 %v1793_v1 }
  0x96   : > { %1403 = vmatpush1.bf16.msra.mxu0 %v1996_v34 }
  0x97   : > { %1405 = vmatprep.subr.bf16.mxu0 %v2002_v37  ;;  %1428 = vmatpush3.bf16.msra.mxu1 %v2010_v47 }
  0x98   : > { %1429 = vmatprep.subr.bf16.mxu1 %v1793_v1 }
  0x9a   : > { %1407 = vmatpush1.bf16.msra.mxu0 %v2007_v45 }
  0x9b   : > { %1409 = vmatprep.subr.bf16.mxu0 %v2018_v49  ;;  %1431 = vmatpush3.bf16.msra.mxu1 %v2028_v58 }
  0x9c   : > { %1432 = vmatprep.subr.bf16.mxu1 %v1793_v1 }
  0x9e   : > { %1411 = vmatpush1.bf16.msra.mxu0 %v2025_v56 }
  0x9f   : > { %1413 = vmatprep.subr.bf16.mxu0 %v2032_v60  ;;  %1434 = vmatpush3.bf16.msra.mxu1 %v2039_v8 }
  0xa0   : > { %1435 = vmatprep.subr.bf16.mxu1 %v1793_v1 }
  0xa2   : > { %1415 = vmatpush1.bf16.msra.mxu0 %v2036_v5 }
  0xa3   : > { %1417 = vmatprep.subr.bf16.mxu0 %v2042_v9  ;;  %1437 = vmatpush3.bf16.msra.mxu1 %v2056_v20 }
  0xa4   : > { %1438 = vmatprep.subr.bf16.mxu1 %v1793_v1 }
  0xa6   : > { %1419 = vmatpush1.bf16.msra.mxu0 %v2046_v15 }
  0xa7   : > { %1445 = vmatprep.subr.bf16.mxu0 %v1969_v7  ;;  %1440 = vmatpush3.bf16.msra.mxu1 %v2066_v26 }
  0xa8   : > { %1441 = vmatprep.subr.bf16.mxu1 %v1793_v1 }
  0xab   : > { %1443 = vmatpush3.bf16.msra.mxu1 %v2072_v29 }
  0xac   : > { %1476 = vmatprep.subr.bf16.mxu1 %v1793_v1 }
  0xf3   : > { %v476_v0 = vpop.permute.xlu0 %475 }
  0xf4   : > { %vm477_vm3 = vcmp.eq.s32.totalorder %v476_v0, 1 }
 0x15c   : > { %v362_v32 = vpop.f32.mrb[0].mxu0 }
 0x15d   : > { %v443_v33 = vadd.f32 %v440_v30, %v362_v32  ;;  %v364_v35 = vpop.f32.mrb[1].mxu0 }
 0x15e   : > { %v450_v40 = vadd.f32 %v441_v38, %v364_v35 }
 0x15f   : > { %v1101_v39 = vmul.f32 -1.442695, %v443_v33  ;;  %v1105_v33 = vld [vmem:[%s1924_s19 + $0x20] sm:$0xff] }
 0x160   : > { %v1102_v41 = vmul.f32 -1.442695, %v450_v40 }
 0x161   : > { %1620 = vpow2.f32 %v1101_v39  ;;  %v433_v42 = vpop.f32.mrb[0].mxu1 }
 0x162   : > { %v1226_v43 = vpop.f32.mrb[1].mxu1  ;;  %1622 = vpow2.f32 %v1102_v41  ;;  %v463_v53 = vadd.f32 %v2118_v51, %v433_v42 }
 0x16b   : > { %v1621_v44 = vpop.eup %1620 }
 0x16c   : > { %v447_v46 = vadd.f32 1.0, %v1621_v44  ;;  %v1623_v50 = vpop.eup %1622 }
 0x16d   : > { %v454_v52 = vadd.f32 1.0, %v1623_v50 }
 0x16e   : > { %1624 = vrcp.f32 %v447_v46  ;;  %v1106_v46 = vld [vmem:[%s1924_s19 + $0x28] sm:$0xff] }
 0x16f   : > { %1626 = vrcp.f32 %v454_v52 }
 0x178   : > { %v1625_v54 = vpop.eup %1624 }
 0x179   : > { %v464_v57 = vmul.f32 %v1625_v54, %v463_v53  ;;  %v1627_v61 = vpop.eup %1626 }
 0x17a   : > { %v467_v62 = vsub.f32 1.0, %v1627_v61  ;;  %v469_v6 = vmul.f32 %v1627_v61, %v2062_v24  ;;  %v1010_v24 = vsel %vm1009_vm5, 1, %v1796_v3 }
 0x17b   : > { %v465_v59 = vadd.f32 %v464_v57, %v442_v55  ;;  %v655_v57 = vpop.permute.xlu0 %654 }
 0x17c   : > { %vm656_vm6 = vcmp.eq.s32.totalorder %v655_v57, 1 }
 0x17d   : > { %1628 = vtanh.f32 %v465_v59 }
 0x187   : > { %v1629_v63 = vpop.eup %1628 }
 0x188   : > { %v468_v4 = vmul.f32 %v1629_v63, %v467_v62 }
 0x18a   : > { %v470_v10 = vadd.f32 %v469_v6, %v468_v4 }
 0x18c   : > { %v2124_v13 = vsel %vm477_vm3, %v470_v10, %v2053_v19  ;;  %v829_v19 = vstv %s828_s21 }
 0x18d   : > { %v2128_v14 = vmul.f32 %v2124_v13, %v2051_v16  ;;  %vm830_vm4 = vcmp.lt.s32.totalorder %v829_v19, %v2015_v48 }
 0x18e   : > { %v831_v22 = vsel %vm830_vm4, 1, %v1796_v3 }
 0x18f   : > { %545 = vmatmul.mubr.f32.vlgmr.msra.gmra.mrb[2].mxu0 %v2128_v14  ;;  %1260 = vmatmul.mubr.f32.vlgmr.msra.gmra.mrb[2].mxu1 %v2128_v14 }
 0x190   : > { %1447 = vmatpush1.bf16.msra.mxu0 %v1975_v11  ;;  %1478 = vmatpush3.bf16.msra.mxu1 %v1992_v31 }
 0x191   : > { %1449 = vmatprep.subr.bf16.mxu0 %v1977_v12  ;;  %1479 = vmatprep.subr.bf16.mxu1 %v1793_v1 }
 0x192   : > { %723 = vmatprep.mubr.f32.mxu0 %v1794_v2  ;;  %1294 = vmatprep.mubr.msk.f32.mxu1 %vm1795_vm0, %v1794_v2 }
 0x193   : > { %833 = vperm.xlu1 %1619, %v831_v22  }
 0x194   : > { %1451 = vmatpush1.bf16.msra.mxu0 %v1981_v17  ;;  %1481 = vmatpush3.bf16.msra.mxu1 %v1999_v36 }
 0x195   : > { %1453 = vmatprep.subr.bf16.mxu0 %v1984_v18  ;;  %1482 = vmatprep.subr.bf16.mxu1 %v1793_v1 }
 0x197   : > { %1012 = vperm.xlu1 %1619, %v1010_v24   ;;  %v1115_v24 = vld [vmem:[%s1924_s19 + $0x50] sm:$0xff] }
 0x198   : > { %1455 = vmatpush1.bf16.msra.mxu0 %v1987_v23  ;;  %1484 = vmatpush3.bf16.msra.mxu1 %v2010_v47 }
 0x199   : > { %1457 = vmatprep.subr.bf16.mxu0 %v1990_v25  ;;  %1485 = vmatprep.subr.bf16.mxu1 %v1793_v1 }
 0x19c   : > { %1459 = vmatpush1.bf16.msra.mxu0 %v1996_v34  ;;  %1487 = vmatpush3.bf16.msra.mxu1 %v2028_v58 }
 0x19d   : > { %1461 = vmatprep.subr.bf16.mxu0 %v2002_v37  ;;  %1488 = vmatprep.subr.bf16.mxu1 %v1793_v1 }
 0x1a0   : > { %1463 = vmatpush1.bf16.msra.mxu0 %v2007_v45  ;;  %1490 = vmatpush3.bf16.msra.mxu1 %v2039_v8 }
 0x1a1   : > { %1465 = vmatprep.subr.bf16.mxu0 %v2018_v49  ;;  %1491 = vmatprep.subr.bf16.mxu1 %v1793_v1 }
 0x1a4   : > { %1467 = vmatpush1.bf16.msra.mxu0 %v2025_v56  ;;  %1493 = vmatpush3.bf16.msra.mxu1 %v2056_v20 }
 0x1a5   : > { %1469 = vmatprep.subr.bf16.mxu0 %v2032_v60  ;;  %1494 = vmatprep.subr.bf16.mxu1 %v1793_v1 }
 0x1a8   : > { %1471 = vmatpush1.bf16.msra.mxu0 %v2036_v5  ;;  %1496 = vmatpush3.bf16.msra.mxu1 %v2066_v26 }
 0x1a9   : > { %1473 = vmatprep.subr.bf16.mxu0 %v2042_v9  ;;  %1497 = vmatprep.subr.bf16.mxu1 %v1793_v1 }
 0x1ac   : > { %1475 = vmatpush1.bf16.msra.mxu0 %v2046_v15  ;;  %1499 = vmatpush3.bf16.msra.mxu1 %v2072_v29 }
 0x1ad   : > { %1501 = vmatprep.subr.bf16.mxu0 %v1969_v7  ;;  %1532 = vmatprep.subr.bf16.mxu1 %v1793_v1 }
 0x262   : > { %v546_v28 = vpop.f32.mrb[2].mxu0  ;;  %v617_v7 = vpop.f32.mrb[2].mxu1 }
 0x263   : > { %v627_v30 = vadd.f32 %v1104_v27, %v546_v28  ;;  %v548_v32 = vpop.f32.mrb[3].mxu0  ;;  %v1261_v35 = vpop.f32.mrb[3].mxu1  ;;  %v641_v3 = vadd.f32 %v2118_v51, %v617_v7 }
 0x264   : > { %v634_v39 = vadd.f32 %v1105_v33, %v548_v32 }
 0x265   : > { %v1107_v38 = vmul.f32 -1.442695, %v627_v30 }
 0x266   : > { %v1108_v40 = vmul.f32 -1.442695, %v634_v39 }
 0x267   : > { %1630 = vpow2.f32 %v1107_v38 }
 0x268   : > { %1632 = vpow2.f32 %v1108_v40  ;;  %v1116_v40 = vld [vmem:[%s1924_s19 + $0x58] sm:$0xff] }
 0x271   : > { %v1631_v48 = vpop.eup %1630 }
 0x272   : > { %v631_v41 = vadd.f32 1.0, %v1631_v48  ;;  %v1633_v42 = vpop.eup %1632 }
 0x273   : > { %v638_v43 = vadd.f32 1.0, %v1633_v42 }
 0x274   : > { %1634 = vrcp.f32 %v631_v41 }
 0x275   : > { %1636 = vrcp.f32 %v638_v43 }
 0x27e   : > { %v1635_v44 = vpop.eup %1634 }
 0x27f   : > { %v642_v50 = vmul.f32 %v1635_v44, %v641_v3  ;;  %v1637_v53 = vpop.eup %1636 }
 0x280   : > { %v645_v54 = vsub.f32 1.0, %v1637_v53  ;;  %v647_v61 = vmul.f32 %v1637_v53, %v2128_v14 }
 0x281   : > { %v643_v52 = vadd.f32 %v1106_v46, %v642_v50 }
 0x283   : > { %1638 = vtanh.f32 %v643_v52 }
 0x28d   : > { %v1639_v55 = vpop.eup %1638 }
 0x28e   : > { %v646_v59 = vmul.f32 %v1639_v55, %v645_v54 }
 0x290   : > { %v648_v62 = vadd.f32 %v647_v61, %v646_v59 }
 0x292   : > { %v2179_v63 = vsel %vm656_vm6, %v648_v62, %v2124_v13  ;;  %v1114_v13 = vld [vmem:[%s1924_s19 + $0x48] sm:$0xff] }
 0x293   : > { %v2183_v0 = vmul.f32 %v2179_v63, %v2051_v16 }
 0x295   : > { %724 = vmatmul.mubr.f32.vlgmr.msra.gmra.mrb[4].mxu0 %v2183_v0  ;;  %1295 = vmatmul.mubr.f32.vlgmr.msra.gmra.mrb[4].mxu1 %v2183_v0 }
 0x296   : > { %1503 = vmatpush1.bf16.msra.mxu0 %v1975_v11  ;;  %1534 = vmatpush3.bf16.msra.mxu1 %v1992_v31 }
 0x297   : > { %1505 = vmatprep.subr.bf16.mxu0 %v1977_v12  ;;  %1535 = vmatprep.subr.bf16.mxu1 %v1793_v1 }
 0x298   : > { %902 = vmatprep.mubr.f32.mxu0 %v1794_v2  ;;  %1329 = vmatprep.mubr.msk.f32.mxu1 %vm1795_vm0, %v1794_v2  ;;  %v1109_v2 = vld [vmem:[%s1924_s19 + $0x30] sm:$0xff] }
 0x29a   : > { %1507 = vmatpush1.bf16.msra.mxu0 %v1981_v17  ;;  %1537 = vmatpush3.bf16.msra.mxu1 %v1999_v36 }
 0x29b   : > { %1509 = vmatprep.subr.bf16.mxu0 %v1984_v18  ;;  %1538 = vmatprep.subr.bf16.mxu1 %v1793_v1 }
 0x29e   : > { %1511 = vmatpush1.bf16.msra.mxu0 %v1987_v23  ;;  %1540 = vmatpush3.bf16.msra.mxu1 %v2010_v47  ;;  %v1110_v23 = vld [vmem:[%s1924_s19 + $0x38] sm:$0xff] }
 0x29f   : > { %1513 = vmatprep.subr.bf16.mxu0 %v1990_v25  ;;  %1541 = vmatprep.subr.bf16.mxu1 %v1793_v1 }
 0x2a2   : > { %1515 = vmatpush1.bf16.msra.mxu0 %v1996_v34  ;;  %1543 = vmatpush3.bf16.msra.mxu1 %v2028_v58  ;;  %v1111_v58 = vld [vmem:[%s1924_s19 + $0x40] sm:$0xff] }
 0x2a3   : > { %1517 = vmatprep.subr.bf16.mxu0 %v2002_v37  ;;  %1544 = vmatprep.subr.bf16.mxu1 %v1793_v1 }
 0x2a6   : > { %1519 = vmatpush1.bf16.msra.mxu0 %v2007_v45  ;;  %1546 = vmatpush3.bf16.msra.mxu1 %v2039_v8 }
 0x2a7   : > { %1521 = vmatprep.subr.bf16.mxu0 %v2018_v49  ;;  %1547 = vmatprep.subr.bf16.mxu1 %v1793_v1 }
 0x2aa   : > { %1523 = vmatpush1.bf16.msra.mxu0 %v2025_v56  ;;  %1549 = vmatpush3.bf16.msra.mxu1 %v2056_v20  ;;  %v834_v20 = vpop.permute.xlu1 %833 }
 0x2ab   : > { %1525 = vmatprep.subr.bf16.mxu0 %v2032_v60  ;;  %1550 = vmatprep.subr.bf16.mxu1 %v1793_v1  ;;  %vm835_vm7 = vcmp.eq.s32.totalorder %v834_v20, 1 }
 0x2ae   : > { %1527 = vmatpush1.bf16.msra.mxu0 %v2036_v5  ;;  %1552 = vmatpush3.bf16.msra.mxu1 %v2066_v26  ;;  %v1013_v44 = vpop.permute.xlu1 %1012 }
 0x2af   : > { %1529 = vmatprep.subr.bf16.mxu0 %v2042_v9  ;;  %1553 = vmatprep.subr.bf16.mxu1 %v1793_v1  ;;  %vm1014_vm8 = vcmp.eq.s32.totalorder %v1013_v44, 1 }
 0x2b2   : > { %1531 = vmatpush1.bf16.msra.mxu0 %v2046_v15  ;;  %1555 = vmatpush3.bf16.msra.mxu1 %v2072_v29 }
 0x368   : > { %v725_v11 = vpop.f32.mrb[4].mxu0  ;;  %v796_v12 = vpop.f32.mrb[4].mxu1 }
 0x369   : > { %v806_v17 = vadd.f32 %v1109_v2, %v725_v11  ;;  %v727_v18 = vpop.f32.mrb[5].mxu0  ;;  %v1296_v25 = vpop.f32.mrb[5].mxu1  ;;  %v820_v49 = vadd.f32 %v2118_v51, %v796_v12 }
 0x36a   : > { %v813_v34 = vadd.f32 %v1110_v23, %v727_v18 }
 0x36b   : > { %v1112_v31 = vmul.f32 -1.442695, %v806_v17 }
 0x36c   : > { %v1113_v36 = vmul.f32 -1.442695, %v813_v34 }
 0x36d   : > { %1640 = vpow2.f32 %v1112_v31 }
 0x36e   : > { %1642 = vpow2.f32 %v1113_v36 }
 0x377   : > { %v1641_v37 = vpop.eup %1640 }
 0x378   : > { %v810_v45 = vadd.f32 1.0, %v1641_v37  ;;  %v1643_v1 = vpop.eup %1642 }
 0x379   : > { %v817_v47 = vadd.f32 1.0, %v1643_v1 }
 0x37a   : > { %1644 = vrcp.f32 %v810_v45 }
 0x37b   : > { %1646 = vrcp.f32 %v817_v47 }
 0x384   : > { %v1645_v56 = vpop.eup %1644 }
 0x385   : > { %v821_v60 = vmul.f32 %v1645_v56, %v820_v49  ;;  %v1647_v8 = vpop.eup %1646 }
 0x386   : > { %v824_v9 = vsub.f32 1.0, %v1647_v8  ;;  %v826_v29 = vmul.f32 %v1647_v8, %v2183_v0 }
 0x387   : > { %v822_v5 = vadd.f32 %v1111_v58, %v821_v60 }
 0x389   : > { %1648 = vtanh.f32 %v822_v5 }
 0x393   : > { %v1649_v15 = vpop.eup %1648 }
 0x394   : > { %v825_v26 = vmul.f32 %v1649_v15, %v824_v9 }
 0x396   : > { %v827_v4 = vadd.f32 %v826_v29, %v825_v26 }
 0x398   : > { %v836_v6 = vsel %vm835_vm7, %v827_v4, %v2179_v63 }
 0x399   : > { %v837_v10 = vmul.f32 %v836_v6, %v2051_v16 }
 0x39b   : > { %903 = vmatmul.mubr.f32.vlgmr.msra.gmra.mrb[6].mxu0 %v837_v10  ;;  %1330 = vmatmul.mubr.f32.vlgmr.msra.gmra.mrb[6].mxu1 %v837_v10 }
 0x46e   : > { %v904_v14 = vpop.f32.mrb[6].mxu0  ;;  %v975_v19 = vpop.f32.mrb[6].mxu1 }
 0x46f   : > { %v985_v21 = vadd.f32 %v1114_v13, %v904_v14  ;;  %v906_v22 = vpop.f32.mrb[7].mxu0  ;;  %v1331_v27 = vpop.f32.mrb[7].mxu1  ;;  %v999_v38 = vadd.f32 %v2118_v51, %v975_v19 }
 0x470   : > { %v992_v7 = vadd.f32 %v1115_v24, %v906_v22 }
 0x471   : > { %v1117_v28 = vmul.f32 -1.442695, %v985_v21 }
 0x472   : > { %v1118_v30 = vmul.f32 -1.442695, %v992_v7 }
 0x473   : > { %1650 = vpow2.f32 %v1117_v28 }
 0x474   : > { %1652 = vpow2.f32 %v1118_v30 }
 0x47d   : > { %v1651_v32 = vpop.eup %1650 }
 0x47e   : > { %v989_v33 = vadd.f32 1.0, %v1651_v32  ;;  %v1653_v35 = vpop.eup %1652 }
 0x47f   : > { %v996_v16 = vadd.f32 1.0, %v1653_v35 }
 0x480   : > { %1654 = vrcp.f32 %v989_v33 }
 0x481   : > { %1656 = vrcp.f32 %v996_v16 }
 0x48a   : > { %v1655_v39 = vpop.eup %1654 }
 0x48b   : > { %v1000_v48 = vmul.f32 %v1655_v39, %v999_v38  ;;  %v1657_v42 = vpop.eup %1656 }
 0x48c   : > { %v1003_v43 = vsub.f32 1.0, %v1657_v42  ;;  %v1005_v50 = vmul.f32 %v1657_v42, %v837_v10 }
 0x48d   : > { %v1001_v41 = vadd.f32 %v1116_v40, %v1000_v48 }
 0x48f   : > { %1658 = vtanh.f32 %v1001_v41 }
 0x499   : > { %v1659_v3 = vpop.eup %1658  ;;  %1024 = sbr.rel (!%p1971_p0) target bundleno = 1184 (0x4a0), region = 64 }
 0x49a   : > { %v1004_v46 = vmul.f32 %v1659_v3, %v1003_v43 }
 0x49c   : > { %v1006_v52 = vadd.f32 %v1005_v50, %v1004_v46 }
 0x49e   : > { %v1015_v53 = vsel %vm1014_vm8, %v1006_v52, %v836_v6 }
 0x49f   : > { %1016 = vst [vmem:[#allocation2] sm:$0xff] %v1015_v53  ;;  %1025 = vst [vmem:[#allocation10] sm:$0xff] (%p1971_p0), %v1015_v53 }
 0x4a0 PF: > { %p1575_p1 = scmp.eq.s32.totalorder %s1855_s0, 2  ;;  %s1797_s19 = smov [#allocation10]  }
 0x4a1   : > { %s1033_s20 = sshll.u32 %s1797_s19, 4  ;;  %s1034_s20 = int_to_ptr.vmem [resolvable:$true] %s1033_s20 }
 0x4a2   : > { %s1718_s23 = scalar_lea.vmem %s1034_s20, 128  ;;  %p1725_p3 = scmp.lt.s32.totalorder %s1034_s20, %s1034_s20 }
 0x4a3   : > { %p1719_p2 = scmp.ne.s32.totalorder %s1034_s20, %s1718_s23  ;;  %p1726_p5 = scmp.lt.s32.totalorder %s1718_s23, %s1718_s23 }
 0x4a5   : > { %p1720_p11 = pnand %p1719_p2, %p1575_p1  ;;  %p1727_p8 = por %p1726_p5, %p1725_p3 }
 0x4a7   : > { %p1721_p13 = pneg %p1720_p11 }
 0x4a9   : > { %p1728_p9 = pnand %p1727_p8, %p1721_p13 }
 0x4ab   : > { %1731 = shalt.err (!%p1728_p9)
}
 0x4ac   : > { %s1732_s8 = scalar_lea.hbm %s2275_s6, 128 }
 0x4ad   : > { %p1733_p7 = scmp.ne.s32.totalorder %s2275_s6, %s1732_s8  ;;  %p1738_p4 = scmp.lt.u32.totalorder %s1732_s8, %s2275_s6 }
 0x4af   : > { %p1734_p10 = pnand %p1733_p7, %p1575_p1 }
 0x4b1   : > { %p1735_p6 = pneg %p1734_p10 }
 0x4b3   : > { %p1740_p12 = pnand %p1738_p4, %p1735_p6 }
 0x4b5   : > { %1743 = shalt.err (!%p1740_p12)
}
 0x4b6   : > { %1566 = dma.vmem_to_hbm [thread:$0]  (%p1575_p1), %s1034_s20, 128, %s2275_s6, [#allocation9]  }
 0x4b7   : > { %1769 = dma.done.wait (%p1575_p1), [#allocation9], 128  }
 0x4b8   : > { %1771 = vsyncadd (%p1575_p1), [#allocation9], 4294967168 }
 0x4b9 PF: > { %p18_p0 = scmp.ge.s32.totalorder %s1858_s27, 5   ;;  %s2285_s23 = smov %s1778_s24 }
 0x4ba   : > { %s2286_s24 = smov %s1782_s25  ;;  %s2287_s25 = smov %s1868_s30 }
 0x4bb   : > { %s2288_s26 = smov %s1858_s27  ;;  %20 = sbr.rel (!%p18_p0) target bundleno = 6 (0x6), region = 101 }
 0x4c2   :  { %1046 = vsyncpa [#allocation8], 1 }
 0x4c3   :  { %1048 = vsyncpa [#allocation8 + $0x1], 1 }
 0x4c4   :  { %1049 = vsyncpa [#allocation9], 1 }
 0x4c5   :  { %1051 = vsyncpa [#allocation9 + $0x1], 1 }
 0x4c6   :  { %1052 = vsyncmov [#allocation4] }
 0x4c9   :  { %s1053_s0 = vpop.sfrf %1052 }
 0x4ca   :  { %p1123_p1 = scmp.ne.s32.totalorder %s1053_s0, 0 }
 0x4cc   :  { %1057 = shalt.err (%p1123_p1)  }

</bundles_post_ra>
